<compile_context>
chip_gen: v5e
topology: v5e:2x2
jax: 0.10.0
libtpu: 0.0.40
codegen_flags: <defaults>
</compile_context>

<pallas_src>
import jax
import jax.numpy as jnp
from jax import lax
from jax.experimental import pallas as pl
from jax.experimental.pallas import tpu as pltpu


def _build_block_weight(w_hwio, W):
    """(3,3,Ci,Co) HWIO -> (3, W*Ci, W*Co) halo-free block weight.

    On a row-padded, lane-packed slab xp[(H+2), W*Ci], each kh tap of a 3x3
    pad-1 conv becomes one matmul: xp[kh:kh+H, :] @ big[kh] -> (H, W*Co), with
      big[kh, (w+kw-1)*Ci + ci, w*Co + co] = w_hwio[kh, kw, ci, co]
    and taps whose source column w+kw-1 is outside [0, W) omitted (they would
    only multiply the zero column padding of the reference conv).
    """
    KH, KW, Ci, Co = w_hwio.shape
    big = jnp.zeros((KH, W * Ci, W * Co), w_hwio.dtype)
    for kw in range(KW):
        for w in range(W):
            src = w + kw - 1
            if 0 <= src < W:
                big = big.at[:, src * Ci:(src + 1) * Ci,
                             w * Co:(w + 1) * Co].set(w_hwio[:, kw])
    return big


def _make_kernel(NB, H, W, Cin, Cmid, Cout):
    f32 = jnp.float32
    bf16 = jnp.bfloat16
    HP = H + 2                 # padded rows per image
    M = NB * HP - 2            # matmul M: one row window per kh tap

    def kernel(x_ref, w1_ref, b1_ref, w2_ref, b2_ref, o_ref, xp_ref, hp_ref):
        # x_ref : (NB, H, W*Cin)   bf16 lane-packed input block
        # w1_ref: (3, W*Cin,  W*Cmid) bf16 block-structured conv1 weight
        # b1_ref: (1, W*Cmid) f32  bias tiled along W
        # w2_ref: (3, W*Cmid, W*Cout) bf16 (trailing x+x folded in: 2*w2)
        # b2_ref: (1, W*Cout) f32  (2*b2)
        # o_ref : (NB, H, W*Cout)  f32 lane-dense output block
        # xp_ref: VMEM (NB*(H+2), W*Cin)  f32 row-padded stacked input slab
        # hp_ref: VMEM (NB*(H+2), W*Cmid) f32 row-padded stacked intermediate slab

        # ---- stack row-padded images: full-width (lane-aligned) interior copies,
        #      only the two 1-row halos per image are zeroed ----
        for b in range(NB):
            base = b * HP
            xp_ref[base:base + 1, :] = jnp.zeros((1, W * Cin), f32)
            xp_ref[base + H + 1:base + HP, :] = jnp.zeros((1, W * Cin), f32)
            xp_ref[base + 1:base + H + 1, :] = x_ref[b].astype(f32)

        # ---- conv1 + bias + ReLU: 3 fat MXU matmuls, M=NB*(H+2)-2, K=W*Cin ----
        acc1 = jnp.broadcast_to(b1_ref[...], (M, W * Cmid))
        for kh in range(3):
            acc1 = acc1 + jnp.dot(xp_ref[kh:kh + M, :].astype(bf16), w1_ref[kh],
                                  preferred_element_type=f32)
        h_all = jnp.maximum(acc1, 0.0)

        # ---- row-pad the intermediate: valid rows of image b are
        #      h_all[b*HP : b*HP+H]; the 2 trailing rows per image are
        #      cross-image garbage and are never read ----
        for b in range(NB):
            base = b * HP
            hp_ref[base:base + 1, :] = jnp.zeros((1, W * Cmid), f32)
            hp_ref[base + H + 1:base + HP, :] = jnp.zeros((1, W * Cmid), f32)
            hp_ref[base + 1:base + H + 1, :] = h_all[base:base + H]

        # ---- conv2: the trailing `x + x` and bias are pre-folded into w2/b2 ----
        acc2 = jnp.broadcast_to(b2_ref[...], (M, W * Cout))
        for kh in range(3):
            acc2 = acc2 + jnp.dot(hp_ref[kh:kh + M, :].astype(bf16), w2_ref[kh],
                                  preferred_element_type=f32)

        # ---- lane-dense (W*Cout = 128 wide) per-image output stores ----
        for b in range(NB):
            base = b * HP
            o_ref[b] = acc2[base:base + H].astype(o_ref.dtype)

    return kernel


def resnet_block_pallas(x_nchw, w1_oihw, b1, w2_oihw, b2):
    """x_nchw: (N, Cin, H, W) float32. Returns (N, Cout, H, W) float32."""
    N, Cin, H, W = x_nchw.shape
    Cmid = w1_oihw.shape[0]
    Cout = w2_oihw.shape[0]
    f32, bf16 = jnp.float32, jnp.bfloat16

    # Images per grid step: largest divisor of N that is <= 8.
    NB = max(d for d in range(1, min(N, 8) + 1) if N % d == 0)

    # ---- lane-packed activations (NHWC flattened to (N, H, W*C)), bf16 in HBM ----
    x_packed = (jnp.transpose(x_nchw, (0, 2, 3, 1))
                .reshape(N, H, W * Cin).astype(bf16))

    # ---- halo-free block-structured weights (bf16) + W-tiled biases (f32) ----
    w1_hwio = jnp.transpose(w1_oihw, (2, 3, 1, 0)).astype(f32)     # (3,3,Cin,Cmid)
    w2_hwio = jnp.transpose(w2_oihw, (2, 3, 1, 0)).astype(f32)     # (3,3,Cmid,Cout)
    w1_big = _build_block_weight(w1_hwio, W).astype(bf16)          # (3, W*Cin,  W*Cmid)
    # Fold the trailing `x + x` into conv2 (exact: power-of-two scale).
    w2_big = (2.0 * _build_block_weight(w2_hwio, W)).astype(bf16)  # (3, W*Cmid, W*Cout)
    b1_tiled = jnp.tile(b1.astype(f32), W).reshape(1, W * Cmid)
    b2_tiled = (2.0 * jnp.tile(b2.astype(f32), W)).reshape(1, W * Cout)

    kernel = _make_kernel(NB, H, W, Cin, Cmid, Cout)

    out_packed = pl.pallas_call(
        kernel,
        out_shape=jax.ShapeDtypeStruct((N, H, W * Cout), f32),
        grid_spec=pltpu.PrefetchScalarGridSpec(
            num_scalar_prefetch=0,
            grid=(N // NB,),
            in_specs=[
                pl.BlockSpec((NB, H, W * Cin), lambda g: (g, 0, 0)),
                pl.BlockSpec((3, W * Cin, W * Cmid), lambda g: (0, 0, 0)),
                pl.BlockSpec((1, W * Cmid), lambda g: (0, 0)),
                pl.BlockSpec((3, W * Cmid, W * Cout), lambda g: (0, 0, 0)),
                pl.BlockSpec((1, W * Cout), lambda g: (0, 0)),
            ],
            out_specs=pl.BlockSpec((NB, H, W * Cout), lambda g: (g, 0, 0)),
            scratch_shapes=[
                pltpu.VMEM((NB * (H + 2), W * Cin), f32),
                pltpu.VMEM((NB * (H + 2), W * Cmid), f32),
            ],
        ),
        compiler_params=pltpu.CompilerParams(
            dimension_semantics=("parallel",)),
    )(x_packed, w1_big, b1_tiled, w2_big, b2_tiled)

    out_nhwc = out_packed.reshape(N, H, W, Cout)
    return jnp.transpose(out_nhwc, (0, 3, 1, 2))


def _reference(x_nchw, w1_oihw, b1, w2_oihw, b2):
    """Pure-JAX NCHW reference (mirrors PyTorch conv2d semantics)."""
    dn = ("NCHW", "OIHW", "NCHW")
    h = lax.conv_general_dilated(x_nchw, w1_oihw, (1, 1), ((1, 1), (1, 1)),
                                 dimension_numbers=dn)
    h = h + b1[None, :, None, None]
    h = jnp.maximum(h, 0.0)
    y = lax.conv_general_dilated(h, w2_oihw, (1, 1), ((1, 1), (1, 1)),
                                 dimension_numbers=dn)
    y = y + b2[None, :, None, None]
    return y + y


if __name__ == "__main__":
    N, Cin, Cout, H, W = 2, 4, 8, 16, 16

    key = jax.random.PRNGKey(0)
    kx, kw1, kb1, kw2, kb2 = jax.random.split(key, 5)

    x = jax.random.normal(kx, (N, Cin, H, W), dtype=jnp.float32)
    # PyTorch layout: OIHW weights, per-channel bias.
    w1 = jax.random.normal(kw1, (Cout, Cin, 3, 3), dtype=jnp.float32) * 0.1
    b1 = jax.random.normal(kb1, (Cout,), dtype=jnp.float32) * 0.1
    w2 = jax.random.normal(kw2, (Cout, Cout, 3, 3), dtype=jnp.float32) * 0.1
    b2 = jax.random.normal(kb2, (Cout,), dtype=jnp.float32) * 0.1

    out = resnet_block_pallas(x, w1, b1, w2, b2)
    out = jax.block_until_ready(out)

    ref = _reference(x, w1, b1, w2, b2)
    assert out.shape == (N, Cout, H, W)
    # bf16 MXU operands (per perf feedback) -> tolerance looser than the old f32 1e-3.
    max_err = jnp.max(jnp.abs(out - ref))
    assert jnp.allclose(out, ref, atol=5e-2, rtol=5e-2), f"max abs err {max_err}"

    print("KERNEL_OK")
</pallas_src>

<mosaic_0001>
module attributes {stable_mosaic.version = 11 : i64} {
  func.func @kernel(%arg0: i32, %arg1: memref<2x16x64xbf16, #tpu.memory_space<vmem>>, %arg2: memref<3x64x128xbf16, #tpu.memory_space<vmem>>, %arg3: memref<1x128xf32, #tpu.memory_space<vmem>>, %arg4: memref<3x128x128xbf16, #tpu.memory_space<vmem>>, %arg5: memref<1x128xf32, #tpu.memory_space<vmem>>, %arg6: memref<2x16x128xf32, #tpu.memory_space<vmem>>, %arg7: memref<36x64xf32, #tpu.memory_space<vmem>>, %arg8: memref<36x128xf32, #tpu.memory_space<vmem>>) attributes {dimension_semantics = [#tpu.dimension_semantics<parallel>], iteration_bounds = array<i64: 1>, scalar_prefetch = 0 : i64, scratch_operands = 2 : i64, tpu.core_type = #tpu.core_type<tc>, window_params = [{transform_indices = @transform_0, window_bounds = array<i64: 2, 16, 64>}, {pipeline_mode = #tpu.pipeline_mode<synchronous>, transform_indices = @transform_1, window_bounds = array<i64: 3, 64, 128>}, {pipeline_mode = #tpu.pipeline_mode<synchronous>, transform_indices = @transform_2, window_bounds = array<i64: 1, 128>}, {pipeline_mode = #tpu.pipeline_mode<synchronous>, transform_indices = @transform_3, window_bounds = array<i64: 3, 128, 128>}, {pipeline_mode = #tpu.pipeline_mode<synchronous>, transform_indices = @transform_4, window_bounds = array<i64: 1, 128>}, {transform_indices = @transform_5, window_bounds = array<i64: 2, 16, 128>}]} {
    %cst = arith.constant 0.000000e+00 : f32
    %0 = vector.broadcast %cst : f32 to vector<1x64xf32>
    %c0 = arith.constant 0 : index
    %c0_0 = arith.constant 0 : index
    %1 = vector.load %arg7[%c0, %c0_0] : memref<36x64xf32, #tpu.memory_space<vmem>>, vector<1x64xf32>
    tpu.vector_store %arg7[%c0, %c0_0], %0 {strides = array<i32>} : memref<36x64xf32, #tpu.memory_space<vmem>>, vector<1x64xf32>,
    %cst_1 = arith.constant 0.000000e+00 : f32
    %2 = vector.broadcast %cst_1 : f32 to vector<1x64xf32>
    %c17 = arith.constant 17 : index
    %c0_2 = arith.constant 0 : index
    %3 = vector.load %arg7[%c17, %c0_2] : memref<36x64xf32, #tpu.memory_space<vmem>>, vector<1x64xf32>
    tpu.vector_store %arg7[%c17, %c0_2], %2 {strides = array<i32>} : memref<36x64xf32, #tpu.memory_space<vmem>>, vector<1x64xf32>,
    %c0_3 = arith.constant 0 : index
    %c0_4 = arith.constant 0 : index
    %c0_5 = arith.constant 0 : index
    %4 = vector.load %arg1[%c0_3, %c0_4, %c0_5] : memref<2x16x64xbf16, #tpu.memory_space<vmem>>, vector<1x16x64xbf16>
    %5 = vector.shape_cast %4 : vector<1x16x64xbf16> to vector<16x64xbf16>
    %6 = arith.extf %5 : vector<16x64xbf16> to vector<16x64xf32>
    %c1 = arith.constant 1 : index
    %c0_6 = arith.constant 0 : index
    %7 = vector.load %arg7[%c1, %c0_6] : memref<36x64xf32, #tpu.memory_space<vmem>>, vector<16x64xf32>
    tpu.vector_store %arg7[%c1, %c0_6], %6 {strides = array<i32>} : memref<36x64xf32, #tpu.memory_space<vmem>>, vector<16x64xf32>,
    %cst_7 = arith.constant 0.000000e+00 : f32
    %8 = vector.broadcast %cst_7 : f32 to vector<1x64xf32>
    %c18 = arith.constant 18 : index
    %c0_8 = arith.constant 0 : index
    %9 = vector.load %arg7[%c18, %c0_8] : memref<36x64xf32, #tpu.memory_space<vmem>>, vector<1x64xf32>
    tpu.vector_store %arg7[%c18, %c0_8], %8 {strides = array<i32>} : memref<36x64xf32, #tpu.memory_space<vmem>>, vector<1x64xf32>,
    %cst_9 = arith.constant 0.000000e+00 : f32
    %10 = vector.broadcast %cst_9 : f32 to vector<1x64xf32>
    %c35 = arith.constant 35 : index
    %c0_10 = arith.constant 0 : index
    %11 = vector.load %arg7[%c35, %c0_10] : memref<36x64xf32, #tpu.memory_space<vmem>>, vector<1x64xf32>
    tpu.vector_store %arg7[%c35, %c0_10], %10 {strides = array<i32>} : memref<36x64xf32, #tpu.memory_space<vmem>>, vector<1x64xf32>,
    %c1_11 = arith.constant 1 : index
    %c0_12 = arith.constant 0 : index
    %c0_13 = arith.constant 0 : index
    %12 = vector.load %arg1[%c1_11, %c0_12, %c0_13] : memref<2x16x64xbf16, #tpu.memory_space<vmem>>, vector<1x16x64xbf16>
    %13 = vector.shape_cast %12 : vector<1x16x64xbf16> to vector<16x64xbf16>
    %14 = arith.extf %13 : vector<16x64xbf16> to vector<16x64xf32>
    %c19 = arith.constant 19 : index
    %c0_14 = arith.constant 0 : index
    %15 = vector.load %arg7[%c19, %c0_14] : memref<36x64xf32, #tpu.memory_space<vmem>>, vector<16x64xf32>
    tpu.vector_store %arg7[%c19, %c0_14], %14 {strides = array<i32>} : memref<36x64xf32, #tpu.memory_space<vmem>>, vector<16x64xf32>,
    %c0_15 = arith.constant 0 : index
    %c0_16 = arith.constant 0 : index
    %16 = vector.load %arg3[%c0_15, %c0_16] : memref<1x128xf32, #tpu.memory_space<vmem>>, vector<1x128xf32>
    %17 = vector.shape_cast %16 : vector<1x128xf32> to vector<1x128xf32>
    %18 = vector.broadcast %17 : vector<1x128xf32> to vector<34x128xf32>
    %c0_17 = arith.constant 0 : index
    %c0_18 = arith.constant 0 : index
    %19 = vector.load %arg7[%c0_17, %c0_18] : memref<36x64xf32, #tpu.memory_space<vmem>>, vector<34x64xf32>
    %20 = arith.truncf %19 : vector<34x64xf32> to vector<34x64xbf16>
    %c0_19 = arith.constant 0 : index
    %c0_20 = arith.constant 0 : index
    %c0_21 = arith.constant 0 : index
    %21 = vector.load %arg2[%c0_19, %c0_20, %c0_21] : memref<3x64x128xbf16, #tpu.memory_space<vmem>>, vector<1x64x128xbf16>
    %22 = vector.shape_cast %21 : vector<1x64x128xbf16> to vector<64x128xbf16>
    %cst_22 = arith.constant dense<0.000000e+00> : vector<34x128xf32>
    %23 = tpu.matmul %20, %22, %cst_22 {dimension_numbers = #tpu.dot_dimension_numbers<[1], [0], [0], [1], [0, 0, 1, 1], [], []>} : vector<34x64xbf16>, vector<64x128xbf16>, vector<34x128xf32> -> vector<34x128xf32>
    %24 = arith.addf %18, %23 : vector<34x128xf32>
    %c1_23 = arith.constant 1 : index
    %c0_24 = arith.constant 0 : index
    %25 = vector.load %arg7[%c1_23, %c0_24] : memref<36x64xf32, #tpu.memory_space<vmem>>, vector<34x64xf32>
    %26 = arith.truncf %25 : vector<34x64xf32> to vector<34x64xbf16>
    %c1_25 = arith.constant 1 : index
    %c0_26 = arith.constant 0 : index
    %c0_27 = arith.constant 0 : index
    %27 = vector.load %arg2[%c1_25, %c0_26, %c0_27] : memref<3x64x128xbf16, #tpu.memory_space<vmem>>, vector<1x64x128xbf16>
    %28 = vector.shape_cast %27 : vector<1x64x128xbf16> to vector<64x128xbf16>
    %cst_28 = arith.constant dense<0.000000e+00> : vector<34x128xf32>
    %29 = tpu.matmul %26, %28, %cst_28 {dimension_numbers = #tpu.dot_dimension_numbers<[1], [0], [0], [1], [0, 0, 1, 1], [], []>} : vector<34x64xbf16>, vector<64x128xbf16>, vector<34x128xf32> -> vector<34x128xf32>
    %30 = arith.addf %24, %29 : vector<34x128xf32>
    %c2 = arith.constant 2 : index
    %c0_29 = arith.constant 0 : index
    %31 = vector.load %arg7[%c2, %c0_29] : memref<36x64xf32, #tpu.memory_space<vmem>>, vector<34x64xf32>
    %32 = arith.truncf %31 : vector<34x64xf32> to vector<34x64xbf16>
    %c2_30 = arith.constant 2 : index
    %c0_31 = arith.constant 0 : index
    %c0_32 = arith.constant 0 : index
    %33 = vector.load %arg2[%c2_30, %c0_31, %c0_32] : memref<3x64x128xbf16, #tpu.memory_space<vmem>>, vector<1x64x128xbf16>
    %34 = vector.shape_cast %33 : vector<1x64x128xbf16> to vector<64x128xbf16>
    %cst_33 = arith.constant dense<0.000000e+00> : vector<34x128xf32>
    %35 = tpu.matmul %32, %34, %cst_33 {dimension_numbers = #tpu.dot_dimension_numbers<[1], [0], [0], [1], [0, 0, 1, 1], [], []>} : vector<34x64xbf16>, vector<64x128xbf16>, vector<34x128xf32> -> vector<34x128xf32>
    %36 = arith.addf %30, %35 : vector<34x128xf32>
    %cst_34 = arith.constant 0.000000e+00 : f32
    %37 = vector.broadcast %cst_34 : f32 to vector<34x128xf32>
    %38 = arith.maximumf %36, %37 : vector<34x128xf32>
    %cst_35 = arith.constant 0.000000e+00 : f32
    %39 = vector.broadcast %cst_35 : f32 to vector<1x128xf32>
    %c0_36 = arith.constant 0 : index
    %c0_37 = arith.constant 0 : index
    %40 = vector.load %arg8[%c0_36, %c0_37] : memref<36x128xf32, #tpu.memory_space<vmem>>, vector<1x128xf32>
    tpu.vector_store %arg8[%c0_36, %c0_37], %39 {strides = array<i32>} : memref<36x128xf32, #tpu.memory_space<vmem>>, vector<1x128xf32>,
    %cst_38 = arith.constant 0.000000e+00 : f32
    %41 = vector.broadcast %cst_38 : f32 to vector<1x128xf32>
    %c17_39 = arith.constant 17 : index
    %c0_40 = arith.constant 0 : index
    %42 = vector.load %arg8[%c17_39, %c0_40] : memref<36x128xf32, #tpu.memory_space<vmem>>, vector<1x128xf32>
    tpu.vector_store %arg8[%c17_39, %c0_40], %41 {strides = array<i32>} : memref<36x128xf32, #tpu.memory_space<vmem>>, vector<1x128xf32>,
    %43 = vector.extract_strided_slice %38 {offsets = [0, 0], sizes = [16, 128], strides = [1, 1]} : vector<34x128xf32> to vector<16x128xf32>
    %c1_41 = arith.constant 1 : index
    %c0_42 = arith.constant 0 : index
    %44 = vector.load %arg8[%c1_41, %c0_42] : memref<36x128xf32, #tpu.memory_space<vmem>>, vector<16x128xf32>
    tpu.vector_store %arg8[%c1_41, %c0_42], %43 {strides = array<i32>} : memref<36x128xf32, #tpu.memory_space<vmem>>, vector<16x128xf32>,
    %cst_43 = arith.constant 0.000000e+00 : f32
    %45 = vector.broadcast %cst_43 : f32 to vector<1x128xf32>
    %c18_44 = arith.constant 18 : index
    %c0_45 = arith.constant 0 : index
    %46 = vector.load %arg8[%c18_44, %c0_45] : memref<36x128xf32, #tpu.memory_space<vmem>>, vector<1x128xf32>
    tpu.vector_store %arg8[%c18_44, %c0_45], %45 {strides = array<i32>} : memref<36x128xf32, #tpu.memory_space<vmem>>, vector<1x128xf32>,
    %cst_46 = arith.constant 0.000000e+00 : f32
    %47 = vector.broadcast %cst_46 : f32 to vector<1x128xf32>
    %c35_47 = arith.constant 35 : index
    %c0_48 = arith.constant 0 : index
    %48 = vector.load %arg8[%c35_47, %c0_48] : memref<36x128xf32, #tpu.memory_space<vmem>>, vector<1x128xf32>
    tpu.vector_store %arg8[%c35_47, %c0_48], %47 {strides = array<i32>} : memref<36x128xf32, #tpu.memory_space<vmem>>, vector<1x128xf32>,
    %49 = vector.extract_strided_slice %38 {offsets = [18, 0], sizes = [16, 128], strides = [1, 1]} : vector<34x128xf32> to vector<16x128xf32>
    %c19_49 = arith.constant 19 : index
    %c0_50 = arith.constant 0 : index
    %50 = vector.load %arg8[%c19_49, %c0_50] : memref<36x128xf32, #tpu.memory_space<vmem>>, vector<16x128xf32>
    tpu.vector_store %arg8[%c19_49, %c0_50], %49 {strides = array<i32>} : memref<36x128xf32, #tpu.memory_space<vmem>>, vector<16x128xf32>,
    %c0_51 = arith.constant 0 : index
    %c0_52 = arith.constant 0 : index
    %51 = vector.load %arg5[%c0_51, %c0_52] : memref<1x128xf32, #tpu.memory_space<vmem>>, vector<1x128xf32>
    %52 = vector.shape_cast %51 : vector<1x128xf32> to vector<1x128xf32>
    %53 = vector.broadcast %52 : vector<1x128xf32> to vector<34x128xf32>
    %c0_53 = arith.constant 0 : index
    %c0_54 = arith.constant 0 : index
    %54 = vector.load %arg8[%c0_53, %c0_54] : memref<36x128xf32, #tpu.memory_space<vmem>>, vector<34x128xf32>
    %55 = arith.truncf %54 : vector<34x128xf32> to vector<34x128xbf16>
    %c0_55 = arith.constant 0 : index
    %c0_56 = arith.constant 0 : index
    %c0_57 = arith.constant 0 : index
    %56 = vector.load %arg4[%c0_55, %c0_56, %c0_57] : memref<3x128x128xbf16, #tpu.memory_space<vmem>>, vector<1x128x128xbf16>
    %57 = vector.shape_cast %56 : vector<1x128x128xbf16> to vector<128x128xbf16>
    %cst_58 = arith.constant dense<0.000000e+00> : vector<34x128xf32>
    %58 = tpu.matmul %55, %57, %cst_58 {dimension_numbers = #tpu.dot_dimension_numbers<[1], [0], [0], [1], [0, 0, 1, 1], [], []>} : vector<34x128xbf16>, vector<128x128xbf16>, vector<34x128xf32> -> vector<34x128xf32>
    %59 = arith.addf %53, %58 : vector<34x128xf32>
    %c1_59 = arith.constant 1 : index
    %c0_60 = arith.constant 0 : index
    %60 = vector.load %arg8[%c1_59, %c0_60] : memref<36x128xf32, #tpu.memory_space<vmem>>, vector<34x128xf32>
    %61 = arith.truncf %60 : vector<34x128xf32> to vector<34x128xbf16>
    %c1_61 = arith.constant 1 : index
    %c0_62 = arith.constant 0 : index
    %c0_63 = arith.constant 0 : index
    %62 = vector.load %arg4[%c1_61, %c0_62, %c0_63] : memref<3x128x128xbf16, #tpu.memory_space<vmem>>, vector<1x128x128xbf16>
    %63 = vector.shape_cast %62 : vector<1x128x128xbf16> to vector<128x128xbf16>
    %cst_64 = arith.constant dense<0.000000e+00> : vector<34x128xf32>
    %64 = tpu.matmul %61, %63, %cst_64 {dimension_numbers = #tpu.dot_dimension_numbers<[1], [0], [0], [1], [0, 0, 1, 1], [], []>} : vector<34x128xbf16>, vector<128x128xbf16>, vector<34x128xf32> -> vector<34x128xf32>
    %65 = arith.addf %59, %64 : vector<34x128xf32>
    %c2_65 = arith.constant 2 : index
    %c0_66 = arith.constant 0 : index
    %66 = vector.load %arg8[%c2_65, %c0_66] : memref<36x128xf32, #tpu.memory_space<vmem>>, vector<34x128xf32>
    %67 = arith.truncf %66 : vector<34x128xf32> to vector<34x128xbf16>
    %c2_67 = arith.constant 2 : index
    %c0_68 = arith.constant 0 : index
    %c0_69 = arith.constant 0 : index
    %68 = vector.load %arg4[%c2_67, %c0_68, %c0_69] : memref<3x128x128xbf16, #tpu.memory_space<vmem>>, vector<1x128x128xbf16>
    %69 = vector.shape_cast %68 : vector<1x128x128xbf16> to vector<128x128xbf16>
    %cst_70 = arith.constant dense<0.000000e+00> : vector<34x128xf32>
    %70 = tpu.matmul %67, %69, %cst_70 {dimension_numbers = #tpu.dot_dimension_numbers<[1], [0], [0], [1], [0, 0, 1, 1], [], []>} : vector<34x128xbf16>, vector<128x128xbf16>, vector<34x128xf32> -> vector<34x128xf32>
    %71 = arith.addf %65, %70 : vector<34x128xf32>
    %72 = vector.extract_strided_slice %71 {offsets = [0, 0], sizes = [16, 128], strides = [1, 1]} : vector<34x128xf32> to vector<16x128xf32>
    %c0_71 = arith.constant 0 : index
    %c0_72 = arith.constant 0 : index
    %c0_73 = arith.constant 0 : index
    %73 = vector.load %arg6[%c0_71, %c0_72, %c0_73] : memref<2x16x128xf32, #tpu.memory_space<vmem>>, vector<1x16x128xf32>
    %74 = vector.shape_cast %73 : vector<1x16x128xf32> to vector<16x128xf32>
    %75 = vector.shape_cast %72 : vector<16x128xf32> to vector<1x16x128xf32>
    tpu.vector_store %arg6[%c0_71, %c0_72, %c0_73], %75 {strides = array<i32>} : memref<2x16x128xf32, #tpu.memory_space<vmem>>, vector<1x16x128xf32>,
    %76 = vector.extract_strided_slice %71 {offsets = [18, 0], sizes = [16, 128], strides = [1, 1]} : vector<34x128xf32> to vector<16x128xf32>
    %c1_74 = arith.constant 1 : index
    %c0_75 = arith.constant 0 : index
    %c0_76 = arith.constant 0 : index
    %77 = vector.load %arg6[%c1_74, %c0_75, %c0_76] : memref<2x16x128xf32, #tpu.memory_space<vmem>>, vector<1x16x128xf32>
    %78 = vector.shape_cast %77 : vector<1x16x128xf32> to vector<16x128xf32>
    %79 = vector.shape_cast %76 : vector<16x128xf32> to vector<1x16x128xf32>
    tpu.vector_store %arg6[%c1_74, %c0_75, %c0_76], %79 {strides = array<i32>} : memref<2x16x128xf32, #tpu.memory_space<vmem>>, vector<1x16x128xf32>,
    return
  }
  func.func @transform_0(%arg0: i32) -> (i32, i32, i32) {
    %c0_i32 = arith.constant 0 : i32
    %c0_i32_0 = arith.constant 0 : i32
    %c0_i32_1 = arith.constant 0 : i32
    return %arg0, %c0_i32, %c0_i32_0 : i32, i32, i32
  }
  func.func @transform_1(%arg0: i32) -> (i32, i32, i32) {
    %c0_i32 = arith.constant 0 : i32
    %c0_i32_0 = arith.constant 0 : i32
    %c0_i32_1 = arith.constant 0 : i32
    %c0_i32_2 = arith.constant 0 : i32
    return %c0_i32, %c0_i32_0, %c0_i32_1 : i32, i32, i32
  }
  func.func @transform_2(%arg0: i32) -> (i32, i32) {
    %c0_i32 = arith.constant 0 : i32
    %c0_i32_0 = arith.constant 0 : i32
    %c0_i32_1 = arith.constant 0 : i32
    return %c0_i32, %c0_i32_0 : i32, i32
  }
  func.func @transform_3(%arg0: i32) -> (i32, i32, i32) {
    %c0_i32 = arith.constant 0 : i32
    %c0_i32_0 = arith.constant 0 : i32
    %c0_i32_1 = arith.constant 0 : i32
    %c0_i32_2 = arith.constant 0 : i32
    return %c0_i32, %c0_i32_0, %c0_i32_1 : i32, i32, i32
  }
  func.func @transform_4(%arg0: i32) -> (i32, i32) {
    %c0_i32 = arith.constant 0 : i32
    %c0_i32_0 = arith.constant 0 : i32
    %c0_i32_1 = arith.constant 0 : i32
    return %c0_i32, %c0_i32_0 : i32, i32
  }
  func.func @transform_5(%arg0: i32) -> (i32, i32, i32) {
    %c0_i32 = arith.constant 0 : i32
    %c0_i32_0 = arith.constant 0 : i32
    %c0_i32_1 = arith.constant 0 : i32
    return %arg0, %c0_i32, %c0_i32_0 : i32, i32, i32
  }
}

</mosaic_0001>

<bundles_post_ra>
// kernel: tpu_custom_call.1
= control target key start
LH: loop header
LB: loop body
LE: loop exit
PB: predicated region body
PF: predicated region fallthrough
CT: control target
= control target key end

     0   :  { %10 = vsyncpa [#allocation5], 0  ;;  %s1066_s0 = inlined_call_operand.hbm [shape: bf16[2,16,64], index: 0, kind: input, shape index: {}]   ;;  %s1067_s1 = inlined_call_operand.hbm [shape: bf16[3,64,128], index: 1, kind: input, shape index: {}]   ;;  %s1068_s2 = inlined_call_operand.vmem [shape: f32[1,128], index: 2, kind: input, shape index: {}]   ;;  %s1069_s3 = inlined_call_operand.hbm [shape: bf16[3,128,128], index: 3, kind: input, shape index: {}]   ;;  %s1070_s4 = inlined_call_operand.vmem [shape: f32[1,128], index: 4, kind: input, shape index: {}]   ;;  %s1071_s5 = inlined_call_operand.hbm [shape: f32[2,16,128], index: 5, kind: output, shape index: {}]  }
   0x1   :  { %11 = vsyncpa [#allocation8], 0 }
   0x2   :  { %12 = vsyncpa [#allocation6], 0  ;;  %s30_s20 = sshll.u32 %s1067_s1, 4  ;;  %s989_s21 = smov [#allocation7]   ;;  %s31_s20 = int_to_ptr.hbm [resolvable:$true] %s30_s20 }
   0x3   :  { %s32_s22 = sshll.u32 %s989_s21, 4  ;;  %s17_s25 = sshll.u32 %s1066_s0, 4  ;;  %s33_s22 = int_to_ptr.vmem [resolvable:$true] %s32_s22  ;;  %s18_s25 = int_to_ptr.hbm [resolvable:$true] %s17_s25 }
   0x4   :  { %s990_s26 = smov 64   ;;  %s991_s27 = smov 4  }
   0x5   :  { %38 = dma.hbm_to_vmem [thread:$0]  %s31_s20, 1536, %s33_s22, [#allocation8], %s990_s26, %s990_s26, %s991_s27  }
   0x6   :  { %s992_s28 = smov [#allocation4]   ;;  %s45_s7 = sshll.u32 %s1069_s3, 4  ;;  %s46_s7 = int_to_ptr.hbm [resolvable:$true] %s45_s7 }
   0x7   :  { %s19_s29 = sshll.u32 %s992_s28, 4  ;;  %s993_s1 = smov [#allocation9]   ;;  %s20_s29 = int_to_ptr.vmem [resolvable:$true] %s19_s29 }
   0x8   :  { %25 = dma.hbm_to_vmem [thread:$0]  %s18_s25, 256, %s20_s29, [#allocation5], %s990_s26, %s990_s26, %s991_s27  }
   0x9   :  { %s47_s8 = sshll.u32 %s993_s1, 4  ;;  %s48_s8 = int_to_ptr.vmem [resolvable:$true] %s47_s8 }
   0xa   :  { %53 = dma.hbm_to_vmem [thread:$0]  %s46_s7, 3072, %s48_s8, [#allocation8], %s990_s26, %s990_s26, %s991_s27  }
   0xb   :  { %983 = dma.done.wait [#allocation5], 256  }
   0xc   :  { %984 = vsyncadd [#allocation5], 4294967040 }
   0xd   :  { %985 = dma.done.wait [#allocation8], 4608  }
   0xe   :  { %986 = vsyncadd [#allocation8], 4294962688  ;;  %v827_v0 = vld [vmem:[#allocation7 + $0x18] sm:$0xff]  ;;  %vm76_vm0 = vcmask 523264   ;;  %v826_v3 = vld [vmem:[#allocation7 + $0x10] sm:$0xff]  ;;  %vm69_vm1 = vcmask 516096  }
   0xf   :  { %v865_v1 = vld [vmem:[#allocation4 + $0x8] sm:$0xff]   ;;  %868 = vmatpush.bf16.msra.mxu2 %v827_v0  ;;  %145 = vmatpush.bf16.msra.mxu0 %v827_v0  ;;  %v994_v5 = vmov 0.0   ;;  %v861_v6 = vld [vmem:[#allocation4] sm:$0xff]   ;;  %v825_v10 = vld [vmem:[#allocation7 + $0x8] sm:$0xff]  ;;  %s657_s13 = sshll.u32 %s1071_s5, 4  ;;  %s996_s14 = smov 128   ;;  %s658_s13 = int_to_ptr.hbm [resolvable:$true] %s657_s13 }
  0x10   :  { %v831_v2 = vld [vmem:[#allocation7 + $0x38] sm:$0xff]  ;;  %v867_v4 = vunpack.c.h.bf16 %v865_v1  ;;  %70 = vst.msk [vmem:[#allocation2] sm:$0x1] %vm69_vm1, %v994_v5  ;;  %v830_v7 = vld [vmem:[#allocation7 + $0x30] sm:$0xff]  ;;  %v862_v8 = vunpack.c.l.bf16 %v861_v6  ;;  %v863_v9 = vunpack.c.h.bf16 %v861_v6  ;;  %v829_v11 = vld [vmem:[#allocation7 + $0x28] sm:$0xff]  ;;  %v866_v22 = vunpack.c.l.bf16 %v865_v1  ;;  %s997_s15 = smov 8  }
  0x11   :  { %223 = vmatpush.bf16.msra.mxu1 %v831_v2  ;;  %71 = vst.msk [vmem:[#allocation2 + $0x11] sm:$0x1] %vm69_vm1, %v994_v5  ;;  %v824_v12 = vld [vmem:[#allocation7] sm:$0xff]  ;;  %v835_v23 = vld [vmem:[#allocation7 + $0x58] sm:$0xff]  ;;  %v834_v29 = vld [vmem:[#allocation7 + $0x50] sm:$0xff] }
  0x12   :  { %87 = vst.msk [vmem:[#allocation2 + $0x1b] sm:$0xff] %vm76_vm0, %v867_v4  ;;  %v828_v15 = vld [vmem:[#allocation7 + $0x20] sm:$0xff]  ;;  %v833_v33 = vld [vmem:[#allocation7 + $0x48] sm:$0xff]  ;;  %v851_v43 = vld [vmem:[#allocation9 + $0x78] sm:$0xff] }
  0x13   :  { %869 = vmatpush.bf16.msra.mxu2 %v826_v3  ;;  %146 = vmatpush.bf16.msra.mxu0 %v826_v3  ;;  %79 = vst.msk [vmem:[#allocation2 + $0x12] sm:$0x1] %vm69_vm1, %v994_v5  ;;  %v832_v34 = vld [vmem:[#allocation7 + $0x40] sm:$0xff]  ;;  %v850_v44 = vld [vmem:[#allocation9 + $0x70] sm:$0xff]  ;;  %v843_v45 = vld [vmem:[#allocation9 + $0x38] sm:$0xff] }
  0x14   :  { %77 = vst.msk [vmem:[#allocation2 + $0x1] sm:$0xff] %vm76_vm0, %v862_v8  ;;  %v859_v46 = vld [vmem:[#allocation9 + $0xb8] sm:$0xff]  ;;  %v849_v47 = vld [vmem:[#allocation9 + $0x68] sm:$0xff]  ;;  %415 = vmatpush.bf16.msra.mxu3 %v843_v45  ;;  %v842_v48 = vld [vmem:[#allocation9 + $0x30] sm:$0xff] }
  0x15   :  { %224 = vmatpush.bf16.msra.mxu1 %v830_v7  ;;  %78 = vst.msk [vmem:[#allocation2 + $0x9] sm:$0xff] %vm76_vm0, %v863_v9  ;;  %v858_v49 = vld [vmem:[#allocation9 + $0xb0] sm:$0xff]  ;;  %v848_v50 = vld [vmem:[#allocation9 + $0x60] sm:$0xff]  ;;  %v841_v51 = vld [vmem:[#allocation9 + $0x28] sm:$0xff] }
  0x16   :  { %80 = vst.msk [vmem:[#allocation2 + $0x23] sm:$0x1] %vm69_vm1, %v994_v5  ;;  %v857_v52 = vld [vmem:[#allocation9 + $0xa8] sm:$0xff]  ;;  %v847_v53 = vld [vmem:[#allocation9 + $0x58] sm:$0xff]  ;;  %v840_v55 = vld [vmem:[#allocation9 + $0x20] sm:$0xff] }
  0x17   :  { %870 = vmatpush.bf16.msra.mxu2 %v825_v10  ;;  %147 = vmatpush.bf16.msra.mxu0 %v825_v10  ;;  %330 = vst [vmem:[#allocation3] sm:$0x1] %v994_v5  ;;  %v856_v56 = vld [vmem:[#allocation9 + $0xa0] sm:$0xff]  ;;  %v846_v57 = vld [vmem:[#allocation9 + $0x50] sm:$0xff]  ;;  %v839_v58 = vld [vmem:[#allocation9 + $0x18] sm:$0xff] }
  0x18   :  { %331 = vst [vmem:[#allocation3 + $0x11] sm:$0x1] %v994_v5  ;;  %416 = vmatpush.bf16.msra.mxu3 %v842_v48  ;;  %v855_v59 = vld [vmem:[#allocation9 + $0x98] sm:$0xff]  ;;  %v845_v60 = vld [vmem:[#allocation9 + $0x48] sm:$0xff]  ;;  %v838_v62 = vld [vmem:[#allocation9 + $0x10] sm:$0xff] }
  0x19   :  { %v96_v13 = vld [vmem:[#allocation2 + $0x20] sm:$0x3]  ;;  %225 = vmatpush.bf16.msra.mxu1 %v829_v11  ;;  %334 = vst [vmem:[#allocation3 + $0x12] sm:$0x1] %v994_v5  ;;  %v854_v63 = vld [vmem:[#allocation9 + $0x90] sm:$0xff]  ;;  %v837_v1 = vld [vmem:[#allocation9 + $0x8] sm:$0xff] }
  0x1a   :  { %v99_v14 = vpack.c.bf16 %v96_v13, %v96_v13  ;;  %335 = vst [vmem:[#allocation3 + $0x23] sm:$0x1] %v994_v5  ;;  %v173_v24 = vld [vmem:[#allocation2 + $0x21] sm:$0x3]  ;;  %v885_v8 = vld [vmem:[%s1068_s2] ss:$0 sm:$0xff] }
  0x1b   :  { %871 = vmatpush.bf16.msra.mxu2 %v824_v12  ;;  %148 = vmatpush.bf16.msra.mxu0 %v824_v12  ;;  %v92_v16 = vld [vmem:[#allocation2] sm:$0xff]  ;;  %86 = vst.msk [vmem:[#allocation2 + $0x13] sm:$0xff] %vm76_vm0, %v866_v22  ;;  %v176_v30 = vpack.c.bf16 %v173_v24, %v173_v24 }
  0x1c   :  { %v169_v17 = vld [vmem:[#allocation2 + $0x1] sm:$0xff]  ;;  %v170_v19 = vld [vmem:[#allocation2 + $0x9] sm:$0xff]  ;;  %417 = vmatpush.bf16.msra.mxu3 %v841_v51 }
  0x1d   :  { %226 = vmatpush.bf16.msra.mxu1 %v828_v15  ;;  %v93_v18 = vld [vmem:[#allocation2 + $0x8] sm:$0xff]  ;;  %v174_v21 = vpack.c.bf16 %v170_v19, %v169_v17  ;;  %v251_v41 = vld [vmem:[#allocation2 + $0x22] sm:$0x3] }
  0x1e   :  { %v97_v20 = vpack.c.bf16 %v93_v18, %v92_v16  ;;  %689 = vmatmul.msk.bf16.vlgmr.msra.gmra.mxu2 %vm76_vm0, %v99_v14  ;;  %v247_v35 = vld [vmem:[#allocation2 + $0x2] sm:$0xff]  ;;  %v248_v36 = vld [vmem:[#allocation2 + $0xa] sm:$0xff]  ;;  %v254_v42 = vpack.c.bf16 %v251_v41, %v251_v41 }
  0x1f   :  { %872 = vmatpush.bf16.msrb.mxu2 %v831_v2  ;;  %v252_v37 = vpack.c.bf16 %v248_v36, %v247_v35  ;;  %516 = vmatpush.bf16.msrb.mxu0 %v851_v43  ;;  %v844_v0 = vld [vmem:[#allocation9 + $0x40] sm:$0xff]  ;;  %v853_v2 = vld [vmem:[#allocation9 + $0x88] sm:$0xff] }
  0x20   :  { %687 = vmatmul.msk.bf16.vlgmr.msra.gmra.mxu0 %vm76_vm0, %v97_v20  ;;  %706 = vmatmul.msk.bf16.vlgmr.msra.gmra.mxu1 %vm76_vm0, %v174_v21  ;;  %v836_v5 = vld [vmem:[#allocation9] sm:$0xff] }
  0x21   :  { %617 = vmatpush.bf16.msrb.mxu1 %v859_v46  ;;  %418 = vmatpush.bf16.msra.mxu3 %v840_v55  ;;  %v852_v6 = vld [vmem:[#allocation9 + $0x80] sm:$0xff] }
  0x22   :  { %v94_v25 = vld [vmem:[#allocation2 + $0x10] sm:$0xff]  ;;  %v95_v26 = vld [vmem:[#allocation2 + $0x18] sm:$0xff] }
  0x23   :  { %873 = vmatpush.bf16.msrb.mxu2 %v830_v7  ;;  %v171_v27 = vld [vmem:[#allocation2 + $0x11] sm:$0xff]  ;;  %v172_v28 = vld [vmem:[#allocation2 + $0x19] sm:$0xff]  ;;  %v98_v31 = vpack.c.bf16 %v95_v26, %v94_v25  ;;  %517 = vmatpush.bf16.msrb.mxu0 %v850_v44 }
  0x24   :  { %v175_v32 = vpack.c.bf16 %v172_v28, %v171_v27  ;;  %v249_v38 = vld [vmem:[#allocation2 + $0x12] sm:$0xff]  ;;  %v250_v39 = vld [vmem:[#allocation2 + $0x1a] sm:$0xff] }
  0x25   :  { %v253_v40 = vpack.c.bf16 %v250_v39, %v249_v38  ;;  %618 = vmatpush.bf16.msrb.mxu1 %v858_v49  ;;  %419 = vmatpush.bf16.msra.mxu3 %v839_v58 }
  0x27   :  { %874 = vmatpush.bf16.msrb.mxu2 %v829_v11  ;;  %518 = vmatpush.bf16.msrb.mxu0 %v849_v47 }
  0x29   :  { %619 = vmatpush.bf16.msrb.mxu1 %v857_v52  ;;  %420 = vmatpush.bf16.msra.mxu3 %v838_v62 }
  0x2b   :  { %875 = vmatpush.bf16.msrb.mxu2 %v828_v15  ;;  %519 = vmatpush.bf16.msrb.mxu0 %v848_v50 }
  0x2d   :  { %620 = vmatpush.bf16.msrb.mxu1 %v856_v56  ;;  %421 = vmatpush.bf16.msra.mxu3 %v837_v1  ;;  %v886_v1 = vld [vmem:[%s1070_s4] ss:$0 sm:$0xff]  ;;  %s995_s4 = smov [#allocation10]  }
  0x2e   :  { %708 = vmatmul.msk.bf16.vlgmr.msrb.gmra.mxu2 %vm76_vm0, %v176_v30  ;;  %s655_s10 = sshll.u32 %s995_s4, 4  ;;  %s656_s10 = int_to_ptr.vmem [resolvable:$true] %s655_s10 }
  0x2f   :  { %301 = vmatpush.bf16.msra.mxu2 %v835_v23  ;;  %520 = vmatpush.bf16.msrb.mxu0 %v847_v53 }
  0x30   :  { %688 = vmatmul.msk.bf16.gmra.mxu0 %vm76_vm0, %v98_v31  ;;  %707 = vmatmul.msk.bf16.gmra.mxu1 %vm76_vm0, %v175_v32 }
  0x31   :  { %621 = vmatpush.bf16.msrb.mxu1 %v855_v59  ;;  %422 = vmatpush.bf16.msra.mxu3 %v836_v5 }
  0x33   :  { %302 = vmatpush.bf16.msra.mxu2 %v834_v29  ;;  %521 = vmatpush.bf16.msrb.mxu0 %v846_v57 }
  0x35   :  { %622 = vmatpush.bf16.msrb.mxu1 %v854_v63 }
  0x37   :  { %303 = vmatpush.bf16.msra.mxu2 %v833_v33  ;;  %522 = vmatpush.bf16.msrb.mxu0 %v845_v60 }
  0x39   :  { %623 = vmatpush.bf16.msrb.mxu1 %v853_v2 }
  0x3b   :  { %304 = vmatpush.bf16.msra.mxu2 %v832_v34  ;;  %523 = vmatpush.bf16.msrb.mxu0 %v844_v0 }
  0x3d   :  { %624 = vmatpush.bf16.msrb.mxu1 %v852_v6 }
  0x3e   :  { %725 = vmatmul.msk.bf16.vlgmr.msra.gmra.mxu2 %vm76_vm0, %v252_v37 }
  0x4e   :  { %726 = vmatmul.msk.bf16.gmra.mxu2 %vm76_vm0, %v253_v40 }
  0x5e   :  { %727 = vmatmul.msk.bf16.gmra.mxu2 %vm76_vm0, %v254_v42 }
  0x9d   :  { %v150_v4 = vpop.f32.mrf.mxu0  ;;  %v228_v7 = vpop.f32.mrf.mxu1 }
  0x9e   :  { %v164_v10 = vadd.f32 %v885_v8, %v150_v4 }
  0xa0   :  { %v242_v12 = vadd.f32 %v228_v7, %v164_v10 }
  0xa1   :  { %v1054_v54 = vpop.f32.mrf.mxu2 }
  0xa2   :  { %v168_v44 = vadd.f32 %v885_v8, %v1054_v54 }
  0xa5   :  { %v152_v11 = vpop.f32.mrf.mxu0  ;;  %v230_v13 = vpop.f32.mrf.mxu1 }
  0xa6   :  { %v165_v16 = vadd.f32 %v885_v8, %v152_v11 }
  0xa8   :  { %v243_v19 = vadd.f32 %v230_v13, %v165_v16 }
  0xa9   :  { %v162_v61 = vpop.f32.mrf.mxu2 }
  0xad   :  { %v155_v18 = vpop.f32.mrf.mxu0  ;;  %v233_v23 = vpop.f32.mrf.mxu1 }
  0xae   :  { %v166_v21 = vadd.f32 %v885_v8, %v155_v18 }
  0xb0   :  { %v244_v25 = vadd.f32 %v233_v23, %v166_v21 }
  0xb1   :  { %v238_v3 = vpop.f32.mrf.mxu2 }
  0xb2   :  { %v246_v46 = vadd.f32 %v238_v3, %v168_v44 }
  0xb5   :  { %v157_v27 = vpop.f32.mrf.mxu0  ;;  %v235_v33 = vpop.f32.mrf.mxu1 }
  0xb6   :  { %v167_v30 = vadd.f32 %v885_v8, %v157_v27 }
  0xb8   :  { %v245_v39 = vadd.f32 %v235_v33, %v167_v30 }
  0xb9   :  { %v240_v9 = vpop.f32.mrf.mxu2 }
  0xc1   :  { %v306_v14 = vpop.f32.mrf.mxu2 }
  0xc2   :  { %v320_v15 = vadd.f32 %v306_v14, %v242_v12 }
  0xc4   :  { %v325_v17 = vmax.f32 %v320_v15, 0.0 }
  0xc6   :  { %332 = vst [vmem:[#allocation3 + $0x1] sm:$0xff] %v325_v17 }
  0xc9   :  { %v308_v20 = vpop.f32.mrf.mxu2 }
  0xca   :  { %v321_v22 = vadd.f32 %v308_v20, %v243_v19 }
  0xcc   :  { %v326_v24 = vmax.f32 %v321_v22, 0.0 }
  0xcd   :  { %v343_v32 = vld [vmem:[#allocation3] sm:$0xff] }
  0xce   :  { %333 = vst [vmem:[#allocation3 + $0x9] sm:$0xff] %v326_v24  ;;  %v448_v26 = vpack.c.bf16 %v326_v24, %v325_v17 }
  0xd0   :  { %524 = vmatmul.bf16.vlgmr.msrb.gmra.mxu0 %v448_v26 }
  0xd1   :  { %v311_v28 = vpop.f32.mrf.mxu2 }
  0xd2   :  { %v322_v29 = vadd.f32 %v311_v28, %v244_v25 }
  0xd4   :  { %v327_v31 = vmax.f32 %v322_v29, 0.0 }
  0xd5   :  { %v344_v34 = vld [vmem:[#allocation3 + $0x8] sm:$0xff] }
  0xd6   :  { %v544_v35 = vld [vmem:[#allocation3 + $0x2] sm:$0xff]  ;;  %v545_v36 = vld [vmem:[#allocation3 + $0xa] sm:$0xff]  ;;  %336 = vst [vmem:[#allocation3 + $0x11] sm:$0xfc] %v327_v31  ;;  %v348_v37 = vpack.c.bf16 %v344_v34, %v343_v32 }
  0xd7   :  { %v549_v38 = vpack.c.bf16 %v545_v36, %v544_v35 }
  0xd8   :  { %423 = vmatmul.bf16.vlgmr.msra.gmra.mxu3 %v348_v37 }
  0xd9   :  { %625 = vmatmul.bf16.vlgmr.msrb.gmra.mxu1 %v549_v38  ;;  %v313_v40 = vpop.f32.mrf.mxu2 }
  0xda   :  { %v323_v41 = vadd.f32 %v313_v40, %v245_v39 }
  0xdc   :  { %v328_v42 = vmax.f32 %v323_v41, 0.0 }
  0xdd   :  { %v445_v43 = vld [vmem:[#allocation3 + $0x11] sm:$0xff] }
  0xde   :  { %337 = vst [vmem:[#allocation3 + $0x19] sm:$0xff] %v328_v42  ;;  %v449_v45 = vpack.c.bf16 %v328_v42, %v445_v43  ;;  %v345_v50 = vld [vmem:[#allocation3 + $0x10] sm:$0xff] }
  0xe0   :  { %529 = vmatmul.bf16.gmra.mxu0 %v449_v45 }
  0xe1   :  { %v316_v47 = vpop.f32.mrf.mxu2 }
  0xe2   :  { %v324_v48 = vadd.f32 %v316_v47, %v246_v46 }
  0xe4   :  { %v329_v49 = vmax.f32 %v324_v48, 0.0 }
  0xe5   :  { %v346_v51 = vld [vmem:[#allocation3 + $0x18] sm:$0xff] }
  0xe6   :  { %338 = vst [vmem:[#allocation3 + $0x21] sm:$0x3] %v329_v49  ;;  %v349_v52 = vpack.c.bf16 %v346_v51, %v345_v50  ;;  %v546_v55 = vld [vmem:[#allocation3 + $0x12] sm:$0xff] }
  0xe8   :  { %428 = vmatmul.bf16.gmra.mxu3 %v349_v52 }
  0xe9   :  { %v318_v53 = vpop.f32.mrf.mxu2 }
  0xed   :  { %v547_v56 = vld [vmem:[#allocation3 + $0x1a] sm:$0xff]  ;;  %v548_v61 = vld [vmem:[#allocation3 + $0x22] sm:$0x3] }
  0xee   :  { %v447_v57 = vld [vmem:[#allocation3 + $0x21] sm:$0x3]  ;;  %v550_v58 = vpack.c.bf16 %v547_v56, %v546_v55  ;;  %v551_v62 = vpack.c.bf16 %v548_v61, %v548_v61 }
  0xef   :  { %v450_v59 = vpack.c.bf16 %v447_v57, %v447_v57  ;;  %v347_v54 = vld [vmem:[#allocation3 + $0x20] sm:$0x3] }
  0xf0   :  { %630 = vmatmul.bf16.gmra.mxu1 %v550_v58  ;;  %v350_v60 = vpack.c.bf16 %v347_v54, %v347_v54 }
  0xf1   :  { %534 = vmatmul.bf16.gmra.mxu0 %v450_v59 }
  0xf8   :  { %433 = vmatmul.bf16.gmra.mxu3 %v350_v60 }
 0x100   :  { %635 = vmatmul.bf16.gmra.mxu1 %v551_v62 }
 0x14d   :  { %v525_v63 = vpop.f32.mrf.mxu0 }
 0x155   :  { %v527_v0 = vpop.f32.mrf.mxu0 }
 0x156   :  { %v626_v2 = vpop.f32.mrf.mxu1 }
 0x15b   :  { %v424_v3 = vpop.f32.mrf.mxu3 }
 0x15c   :  { %v438_v4 = vadd.f32 %v886_v1, %v424_v3 }
 0x15d   :  { %v530_v5 = vpop.f32.mrf.mxu0 }
 0x15e   :  { %v539_v6 = vadd.f32 %v525_v63, %v438_v4  ;;  %v628_v10 = vpop.f32.mrf.mxu1 }
 0x160   :  { %v640_v7 = vadd.f32 %v626_v2, %v539_v6 }
 0x162   :  { %645 = vst [vmem:[#allocation10] sm:$0xff] %v640_v7 }
 0x163   :  { %v426_v8 = vpop.f32.mrf.mxu3 }
 0x164   :  { %v439_v9 = vadd.f32 %v886_v1, %v426_v8 }
 0x165   :  { %v532_v11 = vpop.f32.mrf.mxu0 }
 0x166   :  { %v540_v12 = vadd.f32 %v527_v0, %v439_v9 }
 0x168   :  { %v641_v13 = vadd.f32 %v628_v10, %v540_v12 }
 0x16a   :  { %646 = vst [vmem:[#allocation10 + $0x8] sm:$0xff] %v641_v13 }
 0x16b   :  { %v429_v14 = vpop.f32.mrf.mxu3 }
 0x16c   :  { %v440_v15 = vadd.f32 %v886_v1, %v429_v14 }
 0x16d   :  { %v631_v16 = vpop.f32.mrf.mxu1 }
 0x16e   :  { %v535_v17 = vpop.f32.mrf.mxu0  ;;  %v541_v18 = vadd.f32 %v530_v5, %v440_v15 }
 0x170   :  { %v642_v19 = vadd.f32 %v631_v16, %v541_v18 }
 0x172   :  { %648 = vst [vmem:[#allocation10 + $0xe] sm:$0xfc] %v642_v19 }
 0x173   :  { %v431_v20 = vpop.f32.mrf.mxu3 }
 0x174   :  { %v441_v21 = vadd.f32 %v886_v1, %v431_v20 }
 0x175   :  { %v633_v22 = vpop.f32.mrf.mxu1 }
 0x176   :  { %v537_v23 = vpop.f32.mrf.mxu0  ;;  %v542_v24 = vadd.f32 %v532_v11, %v441_v21 }
 0x178   :  { %v643_v25 = vadd.f32 %v633_v22, %v542_v24 }
 0x17a   :  { %649 = vst [vmem:[#allocation10 + $0x16] sm:$0xff] %v643_v25 }
 0x17b   :  { %v434_v26 = vpop.f32.mrf.mxu3 }
 0x17c   :  { %v442_v27 = vadd.f32 %v886_v1, %v434_v26 }
 0x17d   :  { %v636_v28 = vpop.f32.mrf.mxu1 }
 0x17e   :  { %v543_v29 = vadd.f32 %v535_v17, %v442_v27 }
 0x180   :  { %v644_v30 = vadd.f32 %v636_v28, %v543_v29 }
 0x182   :  { %650 = vst [vmem:[#allocation10 + $0x1e] sm:$0x3] %v644_v30 }
 0x183   :  { %v436_v31 = vpop.f32.mrf.mxu3  ;;  %663 = dma.vmem_to_hbm [thread:$0]  %s656_s10, 512, %s658_s13, [#allocation6], %s996_s14, %s996_s14, %s997_s15  }
 0x185   :  { %v638_v32 = vpop.f32.mrf.mxu1 }
 0x186   :  { %987 = dma.done.wait [#allocation6], 512  }
 0x187   :  { %988 = vsyncadd [#allocation6], 4294966784 }
 0x188   :  { %668 = vsyncpa [#allocation5], 1 }
 0x189   :  { %669 = vsyncpa [#allocation8], 1 }
 0x18a   :  { %670 = vsyncpa [#allocation6], 1 }

</bundles_post_ra>
